<compile_context>
chip_gen: v6e
topology: v6e:2x2x1
jax: 0.10.0
libtpu: 0.0.40
codegen_flags: <defaults>
</compile_context>

<pallas_src>
import jax
import jax.numpy as jnp
from jax.experimental import pallas as pl
from jax.experimental.pallas import tpu as pltpu


def _add_one_kernel(x_ref, o_ref):
    # x_ref / o_ref are (1,) refs living in SMEM.
    # Single scalar load + scalar add + scalar store: one bundle of scalar-slot work.
    o_ref[0] = x_ref[0] + 1  # weak-typed 1 promotes to the ref dtype (no upcast)


def ynet_forward(x):
    """Ynet.forward: output = input + 1, for a 0-d scalar input."""
    x = jnp.asarray(x)
    if not jnp.issubdtype(x.dtype, jnp.floating):
        x = x.astype(jnp.float32)
    x1d = x.reshape(1)  # lift 0-d -> (1,) for the SMEM ref
    out1d = pl.pallas_call(
        _add_one_kernel,
        out_shape=jax.ShapeDtypeStruct((1,), x1d.dtype),
        in_specs=[pl.BlockSpec(memory_space=pltpu.SMEM)],
        out_specs=pl.BlockSpec(memory_space=pltpu.SMEM),
        # Reuse the input's 4-byte HBM buffer for the output: no separate
        # output allocation / writeback path.
        input_output_aliases={0: 0},
    )(x1d)
    return out1d.reshape(())  # back to 0-d scalar, matching torch semantics


if __name__ == "__main__":
    # Deterministic example input consistent with the module's usage:
    # x = torch.tensor(1.0)  -> 0-d float32 scalar.
    key = jax.random.PRNGKey(0)  # unused (input is a fixed scalar), kept for convention
    x = jnp.float32(1.0)

    out = ynet_forward(x)
    jax.block_until_ready(out)

    expected = jnp.float32(2.0)
    assert out.shape == ()
    assert out.dtype == jnp.float32
    assert jnp.allclose(out, expected), (out, expected)
    print("KERNEL_OK")
</pallas_src>

<mosaic_0001>
module attributes {stable_mosaic.version = 11 : i64} {
  func.func @_add_one_kernel(%arg0: memref<1xf32, #tpu.memory_space<smem>>, %arg1: memref<1xf32, #tpu.memory_space<smem>>) attributes {dimension_semantics = [], scalar_prefetch = 0 : i64, scratch_operands = 0 : i64, tpu.core_type = #tpu.core_type<tc>} {
    %c0 = arith.constant 0 : index
    %0 = memref.load %arg0[%c0] : memref<1xf32, #tpu.memory_space<smem>>
    %cst = arith.constant 1.000000e+00 : f32
    %1 = arith.addf %0, %cst : f32
    %c0_0 = arith.constant 0 : index
    %2 = memref.load %arg1[%c0_0] : memref<1xf32, #tpu.memory_space<smem>>
    memref.store %1, %arg1[%c0_0] : memref<1xf32, #tpu.memory_space<smem>>
    return
  }
}

</mosaic_0001>

<bundles_post_ra>
// kernel: tpu_custom_call.1
= control target key start
LH: loop header
LB: loop body
LE: loop exit
PB: predicated region body
PF: predicated region fallthrough
CT: control target
= control target key end

     0   :  { %7 = vsyncpa [#allocation4], 0  ;;  %s38_s9 = smov [#allocation3]   ;;  %s55_s0 = inlined_call_operand.<no memory space> [shape: f32[1], index: 0, kind: input, shape index: {}, may-alias: {0,1}]   ;;  %s56_s1 = inlined_call_operand.hbm [shape: f32[1], index: 1, kind: output, shape index: {}, may-alias: {0,1}]  }
   0x1   :  { %s11_s8 = sadd.f32 1.0, %s55_s0 }
   0x3   :  { %13 = sst [smem:[#allocation3]] %s11_s8 }
   0x4   :  { %21 = dma.smem_to_hbm %s38_s9, 16, %s56_s1, [#allocation4]  }
   0x5   :  { %36 = dma.done.wait [#allocation4], 16  }
   0x6   :  { %37 = vsyncadd [#allocation4], 4294967280 }
   0x7   :  { %25 = sfence }
   0x8   :  { %26 = vsyncpa [#allocation4], 1 }

</bundles_post_ra>
